<compile_context>
chip_gen: v7x
topology: tpu7x:2x2x1
jax: 0.10.0
libtpu: 0.0.40
codegen_flags: <defaults>
</compile_context>

<pallas_src>
import jax
import jax.numpy as jnp
import numpy as np
from jax import lax
from jax.experimental import pallas as pl
from jax.experimental.pallas import tpu as pltpu


def _make_tap_masks(H, W):
    """(9, H*W) f32 masks: 1 where the 3x3 tap source pixel is in-bounds."""
    hh, ww = np.meshgrid(np.arange(H), np.arange(W), indexing="ij")
    masks = np.zeros((9, H * W), np.float32)
    for t in range(9):
        dh, dw = t // 3 - 1, t % 3 - 1
        valid = ((hh + dh >= 0) & (hh + dh < H) &
                 (ww + dw >= 0) & (ww + dw < W))
        masks[t] = valid.reshape(-1).astype(np.float32)
    return jnp.asarray(masks)


def _make_kernel(H, W):
    HW = H * W

    def kernel(x_ref, m_ref, w1_ref, b1_ref, w2_ref, b2_ref, o_ref):
        # One grid program = one image, feature maps stored as (C, H*W):
        # channel in the sublane dim, flattened spatial in the lane dim.
        x = x_ref[0]            # (Cin, HW)  f32
        masks = m_ref[...]      # (9, HW)    f32

        def im2col(feat):
            # feat: (C, HW) f32  ->  (9*C, HW) f32 patch matrix.
            # Tap (kh, kw) needs feat[.., flat_idx + (kh-1)*W + (kw-1)];
            # realized as a circular lane shift + boundary mask.
            taps = []
            for t in range(9):
                dh, dw = t // 3 - 1, t % 3 - 1
                off = dh * W + dw
                if off == 0:
                    taps.append(feat)                        # center tap, no mask
                else:
                    s = off % HW
                    shifted = jnp.concatenate(
                        [feat[:, s:], feat[:, :s]], axis=1)  # out[i] = feat[i+off]
                    taps.append(shifted * masks[t:t + 1, :])
            return jnp.concatenate(taps, axis=0)

        def mm(w_ref_, rhs):
            # bf16 x bf16 MXU matmul, f32 accumulation.
            return jnp.dot(w_ref_[...], rhs.astype(jnp.bfloat16),
                           preferred_element_type=jnp.float32)

        # ---- conv1 (3x3, SAME) with BN scale folded into w1, + bias + ReLU --
        y1 = jnp.maximum(mm(w1_ref, im2col(x)) + b1_ref[...], 0.0)

        # ---- conv2 + 1x1 shortcut fused into a single MXU matmul ------------
        #   W2f = [s2*W2 | ssc*Wsc],  rhs = [im2col(y1); x],  bias = b2 + bsc
        rhs = jnp.concatenate([im2col(y1), x], axis=0)        # (9*Cout+Cin, HW)
        y2 = mm(w2_ref, rhs) + b2_ref[...]

        # ---- residual already included; final ReLU, lane-dense store --------
        o_ref[0] = jnp.maximum(y2, 0.0)

    return kernel


def basic_block_forward(x_nchw, params):
    """Runs BasicBlock(in_channels, out_channels, stride=1) on NCHW input."""
    N, Cin, H, W = x_nchw.shape
    HW = H * W
    Cout = params["w1f"].shape[0]

    # NCHW -> (N, C, H*W) is a free, contiguous reshape (no transpose, no pad).
    x = x_nchw.reshape(N, Cin, HW).astype(jnp.float32)
    masks = _make_tap_masks(H, W)

    kernel = _make_kernel(H, W)
    full2 = lambda n: (0, 0)

    out = pl.pallas_call(
        kernel,
        out_shape=jax.ShapeDtypeStruct((N, Cout, HW), jnp.float32),
        grid_spec=pltpu.PrefetchScalarGridSpec(
            num_scalar_prefetch=0,
            grid=(N,),
            in_specs=[
                pl.BlockSpec((1, Cin, HW), lambda n: (n, 0, 0)),    # x (once/image)
                pl.BlockSpec((9, HW), full2),                       # tap masks
                pl.BlockSpec((Cout, 9 * Cin), full2),               # w1 (bf16, BN folded)
                pl.BlockSpec((Cout, 1), full2),                     # b1
                pl.BlockSpec((Cout, 9 * Cout + Cin), full2),        # [w2|wsc] (bf16, BN folded)
                pl.BlockSpec((Cout, 1), full2),                     # b2 + bsc
            ],
            out_specs=pl.BlockSpec((1, Cout, HW), lambda n: (n, 0, 0)),
        ),
        # Batch axis is independent -> "parallel" (2-TC sharding on v7x).
        compiler_params=pltpu.CompilerParams(
            dimension_semantics=("parallel",)),
    )(x, masks, params["w1f"], params["b1"], params["w2f"], params["b2f"])

    return out.reshape(N, Cout, H, W)   # back to NCHW (free reshape)


def make_params(key, cin, cout, eps=1e-5):
    """Deterministic synthetic parameters (conv weights + folded inference BN)."""
    ks = jax.random.split(key, 6)

    def bn_fold(k, c):
        kg, kb, km, kv = jax.random.split(k, 4)
        gamma = jax.random.uniform(kg, (c,), minval=0.8, maxval=1.2)
        beta = 0.1 * jax.random.normal(kb, (c,))
        mean = 0.1 * jax.random.normal(km, (c,))
        var = jax.random.uniform(kv, (c,), minval=0.5, maxval=1.5)
        scale = gamma / jnp.sqrt(var + eps)
        bias = beta - mean * scale
        return scale.astype(jnp.float32), bias.astype(jnp.float32)

    # PyTorch conv weight layout (Cout, Cin, KH, KW).
    w1_oihw = 0.1 * jax.random.normal(ks[0], (cout, cin, 3, 3), dtype=jnp.float32)
    w2_oihw = 0.1 * jax.random.normal(ks[1], (cout, cout, 3, 3), dtype=jnp.float32)
    wsc_oihw = 0.1 * jax.random.normal(ks[2], (cout, cin, 1, 1), dtype=jnp.float32)

    s1, b1 = bn_fold(ks[3], cout)
    s2, b2 = bn_fold(ks[4], cout)
    ssc, bsc = bn_fold(ks[5], cout)

    # im2col weight layout: W[co, (kh*3 + kw)*C + ci].
    w1_mat = jnp.transpose(w1_oihw, (0, 2, 3, 1)).reshape(cout, 9 * cin)
    w2_mat = jnp.transpose(w2_oihw, (0, 2, 3, 1)).reshape(cout, 9 * cout)
    wsc_mat = wsc_oihw.reshape(cout, cin)

    # Fold BN scales into f32 weights, THEN cast to bf16 MXU operands.
    w1f = (w1_mat * s1[:, None]).astype(jnp.bfloat16)
    w2f = jnp.concatenate([w2_mat * s2[:, None], wsc_mat * ssc[:, None]],
                          axis=1).astype(jnp.bfloat16)

    return {
        "w1f": w1f, "b1": b1.reshape(cout, 1),
        "w2f": w2f, "b2f": (b2 + bsc).reshape(cout, 1),
        # f32 raw copies kept for the pure-JAX reference
        "_w1_hwio": jnp.transpose(w1_oihw, (2, 3, 1, 0)),
        "_w2_hwio": jnp.transpose(w2_oihw, (2, 3, 1, 0)),
        "_wsc_hwio": jnp.transpose(wsc_oihw, (2, 3, 1, 0)),
        "_s1": s1, "_b1": b1, "_s2": s2, "_b2": b2, "_ssc": ssc, "_bsc": bsc,
    }


def ref_forward(x_nchw, p):
    """Pure-JAX f32 reference (lax.conv) for correctness checking."""
    x = jnp.transpose(x_nchw, (0, 2, 3, 1)).astype(jnp.float32)
    dn = ("NHWC", "HWIO", "NHWC")
    y = lax.conv_general_dilated(x, p["_w1_hwio"], (1, 1), "SAME",
                                 dimension_numbers=dn)
    y = jnp.maximum(y * p["_s1"] + p["_b1"], 0.0)
    y = lax.conv_general_dilated(y, p["_w2_hwio"], (1, 1), "SAME",
                                 dimension_numbers=dn)
    y = y * p["_s2"] + p["_b2"]
    sc = lax.conv_general_dilated(x, p["_wsc_hwio"], (1, 1), "SAME",
                                  dimension_numbers=dn)
    sc = sc * p["_ssc"] + p["_bsc"]
    return jnp.transpose(jnp.maximum(y + sc, 0.0), (0, 3, 1, 2))


if __name__ == "__main__":
    key = jax.random.PRNGKey(0)
    kx, kp = jax.random.split(key)

    N, Cin, Cout, H, W = 2, 4, 8, 16, 16          # in_channels != out_channels
    x = jax.random.normal(kx, (N, Cin, H, W), dtype=jnp.float32)  # NCHW
    params = make_params(kp, Cin, Cout)

    fwd = jax.jit(basic_block_forward)
    out = jax.block_until_ready(fwd(x, params))
    ref = jax.block_until_ready(ref_forward(x, params))

    # Tolerance loosened because the kernel uses bf16 MXU operands
    # (f32 accumulation) while the reference is pure f32.
    np.testing.assert_allclose(np.asarray(out), np.asarray(ref),
                               atol=3e-2, rtol=3e-2)
    print("KERNEL_OK")
</pallas_src>

<mosaic_0001>
module attributes {stable_mosaic.version = 11 : i64} {
  func.func @kernel(%arg0: i32, %arg1: memref<1x4x256xf32, #tpu.memory_space<vmem>>, %arg2: memref<9x256xf32, #tpu.memory_space<vmem>>, %arg3: memref<8x36xbf16, #tpu.memory_space<vmem>>, %arg4: memref<8x1xf32, #tpu.memory_space<vmem>>, %arg5: memref<8x76xbf16, #tpu.memory_space<vmem>>, %arg6: memref<8x1xf32, #tpu.memory_space<vmem>>, %arg7: memref<1x8x256xf32, #tpu.memory_space<vmem>>) attributes {dimension_semantics = [#tpu.dimension_semantics<parallel>], iteration_bounds = array<i64: 2>, scalar_prefetch = 0 : i64, scratch_operands = 0 : i64, tpu.core_type = #tpu.core_type<tc>, window_params = [{transform_indices = @transform_0, window_bounds = array<i64: 1, 4, 256>}, {pipeline_mode = #tpu.pipeline_mode<synchronous>, transform_indices = @transform_1, window_bounds = array<i64: 9, 256>}, {pipeline_mode = #tpu.pipeline_mode<synchronous>, transform_indices = @transform_2, window_bounds = array<i64: 8, 36>}, {pipeline_mode = #tpu.pipeline_mode<synchronous>, transform_indices = @transform_3, window_bounds = array<i64: 8, 1>}, {pipeline_mode = #tpu.pipeline_mode<synchronous>, transform_indices = @transform_4, window_bounds = array<i64: 8, 76>}, {pipeline_mode = #tpu.pipeline_mode<synchronous>, transform_indices = @transform_5, window_bounds = array<i64: 8, 1>}, {transform_indices = @transform_6, window_bounds = array<i64: 1, 8, 256>}]} {
    %c0 = arith.constant 0 : index
    %c0_0 = arith.constant 0 : index
    %c0_1 = arith.constant 0 : index
    %0 = vector.load %arg1[%c0, %c0_0, %c0_1] : memref<1x4x256xf32, #tpu.memory_space<vmem>>, vector<1x4x256xf32>
    %1 = vector.shape_cast %0 : vector<1x4x256xf32> to vector<4x256xf32>
    %c0_2 = arith.constant 0 : index
    %c0_3 = arith.constant 0 : index
    %2 = vector.load %arg2[%c0_2, %c0_3] : memref<9x256xf32, #tpu.memory_space<vmem>>, vector<9x256xf32>
    %3 = vector.extract_strided_slice %1 {offsets = [0, 239], sizes = [4, 17], strides = [1, 1]} : vector<4x256xf32> to vector<4x17xf32>
    %4 = vector.extract_strided_slice %1 {offsets = [0, 0], sizes = [4, 239], strides = [1, 1]} : vector<4x256xf32> to vector<4x239xf32>
    %5 = tpu.concatenate %3, %4 in 1 : vector<4x17xf32>, vector<4x239xf32> -> vector<4x256xf32>
    %6 = vector.extract_strided_slice %2 {offsets = [0, 0], sizes = [1, 256], strides = [1, 1]} : vector<9x256xf32> to vector<1x256xf32>
    %7 = vector.broadcast %6 : vector<1x256xf32> to vector<4x256xf32>
    %8 = arith.mulf %5, %7 : vector<4x256xf32>
    %9 = vector.extract_strided_slice %1 {offsets = [0, 240], sizes = [4, 16], strides = [1, 1]} : vector<4x256xf32> to vector<4x16xf32>
    %10 = vector.extract_strided_slice %1 {offsets = [0, 0], sizes = [4, 240], strides = [1, 1]} : vector<4x256xf32> to vector<4x240xf32>
    %11 = tpu.concatenate %9, %10 in 1 : vector<4x16xf32>, vector<4x240xf32> -> vector<4x256xf32>
    %12 = vector.extract_strided_slice %2 {offsets = [1, 0], sizes = [1, 256], strides = [1, 1]} : vector<9x256xf32> to vector<1x256xf32>
    %13 = vector.broadcast %12 : vector<1x256xf32> to vector<4x256xf32>
    %14 = arith.mulf %11, %13 : vector<4x256xf32>
    %15 = vector.extract_strided_slice %1 {offsets = [0, 241], sizes = [4, 15], strides = [1, 1]} : vector<4x256xf32> to vector<4x15xf32>
    %16 = vector.extract_strided_slice %1 {offsets = [0, 0], sizes = [4, 241], strides = [1, 1]} : vector<4x256xf32> to vector<4x241xf32>
    %17 = tpu.concatenate %15, %16 in 1 : vector<4x15xf32>, vector<4x241xf32> -> vector<4x256xf32>
    %18 = vector.extract_strided_slice %2 {offsets = [2, 0], sizes = [1, 256], strides = [1, 1]} : vector<9x256xf32> to vector<1x256xf32>
    %19 = vector.broadcast %18 : vector<1x256xf32> to vector<4x256xf32>
    %20 = arith.mulf %17, %19 : vector<4x256xf32>
    %21 = vector.extract_strided_slice %1 {offsets = [0, 255], sizes = [4, 1], strides = [1, 1]} : vector<4x256xf32> to vector<4x1xf32>
    %22 = vector.extract_strided_slice %1 {offsets = [0, 0], sizes = [4, 255], strides = [1, 1]} : vector<4x256xf32> to vector<4x255xf32>
    %23 = tpu.concatenate %21, %22 in 1 : vector<4x1xf32>, vector<4x255xf32> -> vector<4x256xf32>
    %24 = vector.extract_strided_slice %2 {offsets = [3, 0], sizes = [1, 256], strides = [1, 1]} : vector<9x256xf32> to vector<1x256xf32>
    %25 = vector.broadcast %24 : vector<1x256xf32> to vector<4x256xf32>
    %26 = arith.mulf %23, %25 : vector<4x256xf32>
    %27 = vector.extract_strided_slice %1 {offsets = [0, 1], sizes = [4, 255], strides = [1, 1]} : vector<4x256xf32> to vector<4x255xf32>
    %28 = vector.extract_strided_slice %1 {offsets = [0, 0], sizes = [4, 1], strides = [1, 1]} : vector<4x256xf32> to vector<4x1xf32>
    %29 = tpu.concatenate %27, %28 in 1 : vector<4x255xf32>, vector<4x1xf32> -> vector<4x256xf32>
    %30 = vector.extract_strided_slice %2 {offsets = [5, 0], sizes = [1, 256], strides = [1, 1]} : vector<9x256xf32> to vector<1x256xf32>
    %31 = vector.broadcast %30 : vector<1x256xf32> to vector<4x256xf32>
    %32 = arith.mulf %29, %31 : vector<4x256xf32>
    %33 = vector.extract_strided_slice %1 {offsets = [0, 15], sizes = [4, 241], strides = [1, 1]} : vector<4x256xf32> to vector<4x241xf32>
    %34 = vector.extract_strided_slice %1 {offsets = [0, 0], sizes = [4, 15], strides = [1, 1]} : vector<4x256xf32> to vector<4x15xf32>
    %35 = tpu.concatenate %33, %34 in 1 : vector<4x241xf32>, vector<4x15xf32> -> vector<4x256xf32>
    %36 = vector.extract_strided_slice %2 {offsets = [6, 0], sizes = [1, 256], strides = [1, 1]} : vector<9x256xf32> to vector<1x256xf32>
    %37 = vector.broadcast %36 : vector<1x256xf32> to vector<4x256xf32>
    %38 = arith.mulf %35, %37 : vector<4x256xf32>
    %39 = vector.extract_strided_slice %1 {offsets = [0, 16], sizes = [4, 240], strides = [1, 1]} : vector<4x256xf32> to vector<4x240xf32>
    %40 = vector.extract_strided_slice %1 {offsets = [0, 0], sizes = [4, 16], strides = [1, 1]} : vector<4x256xf32> to vector<4x16xf32>
    %41 = tpu.concatenate %39, %40 in 1 : vector<4x240xf32>, vector<4x16xf32> -> vector<4x256xf32>
    %42 = vector.extract_strided_slice %2 {offsets = [7, 0], sizes = [1, 256], strides = [1, 1]} : vector<9x256xf32> to vector<1x256xf32>
    %43 = vector.broadcast %42 : vector<1x256xf32> to vector<4x256xf32>
    %44 = arith.mulf %41, %43 : vector<4x256xf32>
    %45 = vector.extract_strided_slice %1 {offsets = [0, 17], sizes = [4, 239], strides = [1, 1]} : vector<4x256xf32> to vector<4x239xf32>
    %46 = vector.extract_strided_slice %1 {offsets = [0, 0], sizes = [4, 17], strides = [1, 1]} : vector<4x256xf32> to vector<4x17xf32>
    %47 = tpu.concatenate %45, %46 in 1 : vector<4x239xf32>, vector<4x17xf32> -> vector<4x256xf32>
    %48 = vector.extract_strided_slice %2 {offsets = [8, 0], sizes = [1, 256], strides = [1, 1]} : vector<9x256xf32> to vector<1x256xf32>
    %49 = vector.broadcast %48 : vector<1x256xf32> to vector<4x256xf32>
    %50 = arith.mulf %47, %49 : vector<4x256xf32>
    %51 = tpu.concatenate %8, %14, %20, %26, %1, %32, %38, %44, %50 in 0 : vector<4x256xf32>, vector<4x256xf32>, vector<4x256xf32>, vector<4x256xf32>, vector<4x256xf32>, vector<4x256xf32>, vector<4x256xf32>, vector<4x256xf32>, vector<4x256xf32> -> vector<36x256xf32>
    %c0_4 = arith.constant 0 : index
    %c0_5 = arith.constant 0 : index
    %52 = vector.load %arg3[%c0_4, %c0_5] : memref<8x36xbf16, #tpu.memory_space<vmem>>, vector<8x36xbf16>
    %53 = arith.truncf %51 : vector<36x256xf32> to vector<36x256xbf16>
    %cst = arith.constant dense<0.000000e+00> : vector<8x256xf32>
    %54 = tpu.matmul %52, %53, %cst {dimension_numbers = #tpu.dot_dimension_numbers<[1], [0], [0], [1], [0, 0, 1, 1], [], []>} : vector<8x36xbf16>, vector<36x256xbf16>, vector<8x256xf32> -> vector<8x256xf32>
    %c0_6 = arith.constant 0 : index
    %c0_7 = arith.constant 0 : index
    %55 = vector.load %arg4[%c0_6, %c0_7] : memref<8x1xf32, #tpu.memory_space<vmem>>, vector<8x1xf32>
    %56 = vector.broadcast %55 : vector<8x1xf32> to vector<8x256xf32>
    %57 = arith.addf %54, %56 : vector<8x256xf32>
    %cst_8 = arith.constant 0.000000e+00 : f32
    %58 = vector.broadcast %cst_8 : f32 to vector<8x256xf32>
    %59 = arith.maximumf %57, %58 : vector<8x256xf32>
    %60 = vector.extract_strided_slice %59 {offsets = [0, 239], sizes = [8, 17], strides = [1, 1]} : vector<8x256xf32> to vector<8x17xf32>
    %61 = vector.extract_strided_slice %59 {offsets = [0, 0], sizes = [8, 239], strides = [1, 1]} : vector<8x256xf32> to vector<8x239xf32>
    %62 = tpu.concatenate %60, %61 in 1 : vector<8x17xf32>, vector<8x239xf32> -> vector<8x256xf32>
    %63 = vector.extract_strided_slice %2 {offsets = [0, 0], sizes = [1, 256], strides = [1, 1]} : vector<9x256xf32> to vector<1x256xf32>
    %64 = vector.broadcast %63 : vector<1x256xf32> to vector<8x256xf32>
    %65 = arith.mulf %62, %64 : vector<8x256xf32>
    %66 = vector.extract_strided_slice %59 {offsets = [0, 240], sizes = [8, 16], strides = [1, 1]} : vector<8x256xf32> to vector<8x16xf32>
    %67 = vector.extract_strided_slice %59 {offsets = [0, 0], sizes = [8, 240], strides = [1, 1]} : vector<8x256xf32> to vector<8x240xf32>
    %68 = tpu.concatenate %66, %67 in 1 : vector<8x16xf32>, vector<8x240xf32> -> vector<8x256xf32>
    %69 = vector.extract_strided_slice %2 {offsets = [1, 0], sizes = [1, 256], strides = [1, 1]} : vector<9x256xf32> to vector<1x256xf32>
    %70 = vector.broadcast %69 : vector<1x256xf32> to vector<8x256xf32>
    %71 = arith.mulf %68, %70 : vector<8x256xf32>
    %72 = vector.extract_strided_slice %59 {offsets = [0, 241], sizes = [8, 15], strides = [1, 1]} : vector<8x256xf32> to vector<8x15xf32>
    %73 = vector.extract_strided_slice %59 {offsets = [0, 0], sizes = [8, 241], strides = [1, 1]} : vector<8x256xf32> to vector<8x241xf32>
    %74 = tpu.concatenate %72, %73 in 1 : vector<8x15xf32>, vector<8x241xf32> -> vector<8x256xf32>
    %75 = vector.extract_strided_slice %2 {offsets = [2, 0], sizes = [1, 256], strides = [1, 1]} : vector<9x256xf32> to vector<1x256xf32>
    %76 = vector.broadcast %75 : vector<1x256xf32> to vector<8x256xf32>
    %77 = arith.mulf %74, %76 : vector<8x256xf32>
    %78 = vector.extract_strided_slice %59 {offsets = [0, 255], sizes = [8, 1], strides = [1, 1]} : vector<8x256xf32> to vector<8x1xf32>
    %79 = vector.extract_strided_slice %59 {offsets = [0, 0], sizes = [8, 255], strides = [1, 1]} : vector<8x256xf32> to vector<8x255xf32>
    %80 = tpu.concatenate %78, %79 in 1 : vector<8x1xf32>, vector<8x255xf32> -> vector<8x256xf32>
    %81 = vector.extract_strided_slice %2 {offsets = [3, 0], sizes = [1, 256], strides = [1, 1]} : vector<9x256xf32> to vector<1x256xf32>
    %82 = vector.broadcast %81 : vector<1x256xf32> to vector<8x256xf32>
    %83 = arith.mulf %80, %82 : vector<8x256xf32>
    %84 = vector.extract_strided_slice %59 {offsets = [0, 1], sizes = [8, 255], strides = [1, 1]} : vector<8x256xf32> to vector<8x255xf32>
    %85 = vector.extract_strided_slice %59 {offsets = [0, 0], sizes = [8, 1], strides = [1, 1]} : vector<8x256xf32> to vector<8x1xf32>
    %86 = tpu.concatenate %84, %85 in 1 : vector<8x255xf32>, vector<8x1xf32> -> vector<8x256xf32>
    %87 = vector.extract_strided_slice %2 {offsets = [5, 0], sizes = [1, 256], strides = [1, 1]} : vector<9x256xf32> to vector<1x256xf32>
    %88 = vector.broadcast %87 : vector<1x256xf32> to vector<8x256xf32>
    %89 = arith.mulf %86, %88 : vector<8x256xf32>
    %90 = vector.extract_strided_slice %59 {offsets = [0, 15], sizes = [8, 241], strides = [1, 1]} : vector<8x256xf32> to vector<8x241xf32>
    %91 = vector.extract_strided_slice %59 {offsets = [0, 0], sizes = [8, 15], strides = [1, 1]} : vector<8x256xf32> to vector<8x15xf32>
    %92 = tpu.concatenate %90, %91 in 1 : vector<8x241xf32>, vector<8x15xf32> -> vector<8x256xf32>
    %93 = vector.extract_strided_slice %2 {offsets = [6, 0], sizes = [1, 256], strides = [1, 1]} : vector<9x256xf32> to vector<1x256xf32>
    %94 = vector.broadcast %93 : vector<1x256xf32> to vector<8x256xf32>
    %95 = arith.mulf %92, %94 : vector<8x256xf32>
    %96 = vector.extract_strided_slice %59 {offsets = [0, 16], sizes = [8, 240], strides = [1, 1]} : vector<8x256xf32> to vector<8x240xf32>
    %97 = vector.extract_strided_slice %59 {offsets = [0, 0], sizes = [8, 16], strides = [1, 1]} : vector<8x256xf32> to vector<8x16xf32>
    %98 = tpu.concatenate %96, %97 in 1 : vector<8x240xf32>, vector<8x16xf32> -> vector<8x256xf32>
    %99 = vector.extract_strided_slice %2 {offsets = [7, 0], sizes = [1, 256], strides = [1, 1]} : vector<9x256xf32> to vector<1x256xf32>
    %100 = vector.broadcast %99 : vector<1x256xf32> to vector<8x256xf32>
    %101 = arith.mulf %98, %100 : vector<8x256xf32>
    %102 = vector.extract_strided_slice %59 {offsets = [0, 17], sizes = [8, 239], strides = [1, 1]} : vector<8x256xf32> to vector<8x239xf32>
    %103 = vector.extract_strided_slice %59 {offsets = [0, 0], sizes = [8, 17], strides = [1, 1]} : vector<8x256xf32> to vector<8x17xf32>
    %104 = tpu.concatenate %102, %103 in 1 : vector<8x239xf32>, vector<8x17xf32> -> vector<8x256xf32>
    %105 = vector.extract_strided_slice %2 {offsets = [8, 0], sizes = [1, 256], strides = [1, 1]} : vector<9x256xf32> to vector<1x256xf32>
    %106 = vector.broadcast %105 : vector<1x256xf32> to vector<8x256xf32>
    %107 = arith.mulf %104, %106 : vector<8x256xf32>
    %108 = tpu.concatenate %65, %71, %77, %83, %59, %89, %95, %101, %107 in 0 : vector<8x256xf32>, vector<8x256xf32>, vector<8x256xf32>, vector<8x256xf32>, vector<8x256xf32>, vector<8x256xf32>, vector<8x256xf32>, vector<8x256xf32>, vector<8x256xf32> -> vector<72x256xf32>
    %109 = tpu.concatenate %108, %1 in 0 : vector<72x256xf32>, vector<4x256xf32> -> vector<76x256xf32>
    %c0_9 = arith.constant 0 : index
    %c0_10 = arith.constant 0 : index
    %110 = vector.load %arg5[%c0_9, %c0_10] : memref<8x76xbf16, #tpu.memory_space<vmem>>, vector<8x76xbf16>
    %111 = arith.truncf %109 : vector<76x256xf32> to vector<76x256xbf16>
    %cst_11 = arith.constant dense<0.000000e+00> : vector<8x256xf32>
    %112 = tpu.matmul %110, %111, %cst_11 {dimension_numbers = #tpu.dot_dimension_numbers<[1], [0], [0], [1], [0, 0, 1, 1], [], []>} : vector<8x76xbf16>, vector<76x256xbf16>, vector<8x256xf32> -> vector<8x256xf32>
    %c0_12 = arith.constant 0 : index
    %c0_13 = arith.constant 0 : index
    %113 = vector.load %arg6[%c0_12, %c0_13] : memref<8x1xf32, #tpu.memory_space<vmem>>, vector<8x1xf32>
    %114 = vector.broadcast %113 : vector<8x1xf32> to vector<8x256xf32>
    %115 = arith.addf %112, %114 : vector<8x256xf32>
    %cst_14 = arith.constant 0.000000e+00 : f32
    %116 = vector.broadcast %cst_14 : f32 to vector<8x256xf32>
    %117 = arith.maximumf %115, %116 : vector<8x256xf32>
    %c0_15 = arith.constant 0 : index
    %c0_16 = arith.constant 0 : index
    %c0_17 = arith.constant 0 : index
    %118 = vector.load %arg7[%c0_15, %c0_16, %c0_17] : memref<1x8x256xf32, #tpu.memory_space<vmem>>, vector<1x8x256xf32>
    %119 = vector.shape_cast %118 : vector<1x8x256xf32> to vector<8x256xf32>
    %120 = vector.shape_cast %117 : vector<8x256xf32> to vector<1x8x256xf32>
    tpu.vector_store %arg7[%c0_15, %c0_16, %c0_17], %120 {strides = array<i32>} : memref<1x8x256xf32, #tpu.memory_space<vmem>>, vector<1x8x256xf32>,
    return
  }
  func.func @transform_0(%arg0: i32) -> (i32, i32, i32) {
    %c0_i32 = arith.constant 0 : i32
    %c0_i32_0 = arith.constant 0 : i32
    %c0_i32_1 = arith.constant 0 : i32
    return %arg0, %c0_i32, %c0_i32_0 : i32, i32, i32
  }
  func.func @transform_1(%arg0: i32) -> (i32, i32) {
    %c0_i32 = arith.constant 0 : i32
    %c0_i32_0 = arith.constant 0 : i32
    %c0_i32_1 = arith.constant 0 : i32
    return %c0_i32, %c0_i32_0 : i32, i32
  }
  func.func @transform_2(%arg0: i32) -> (i32, i32) {
    %c0_i32 = arith.constant 0 : i32
    %c0_i32_0 = arith.constant 0 : i32
    %c0_i32_1 = arith.constant 0 : i32
    return %c0_i32, %c0_i32_0 : i32, i32
  }
  func.func @transform_3(%arg0: i32) -> (i32, i32) {
    %c0_i32 = arith.constant 0 : i32
    %c0_i32_0 = arith.constant 0 : i32
    %c0_i32_1 = arith.constant 0 : i32
    return %c0_i32, %c0_i32_0 : i32, i32
  }
  func.func @transform_4(%arg0: i32) -> (i32, i32) {
    %c0_i32 = arith.constant 0 : i32
    %c0_i32_0 = arith.constant 0 : i32
    %c0_i32_1 = arith.constant 0 : i32
    return %c0_i32, %c0_i32_0 : i32, i32
  }
  func.func @transform_5(%arg0: i32) -> (i32, i32) {
    %c0_i32 = arith.constant 0 : i32
    %c0_i32_0 = arith.constant 0 : i32
    %c0_i32_1 = arith.constant 0 : i32
    return %c0_i32, %c0_i32_0 : i32, i32
  }
  func.func @transform_6(%arg0: i32) -> (i32, i32, i32) {
    %c0_i32 = arith.constant 0 : i32
    %c0_i32_0 = arith.constant 0 : i32
    %c0_i32_1 = arith.constant 0 : i32
    return %arg0, %c0_i32, %c0_i32_0 : i32, i32, i32
  }
}

</mosaic_0001>

<bundles_post_ra>
// kernel: basic_block_forward.1
= control target key start
LH: loop header
LB: loop body
LE: loop exit
PB: predicated region body
PF: predicated region fallthrough
CT: control target
= control target key end

     0   :  { %s829_s21 = smov 0   ;;  %s1074_s0 = inlined_call_operand.vmem [shape: f32[2,4,256], index: 0, kind: input, shape index: {}]   ;;  %s1075_s1 = inlined_call_operand.vmem [shape: f32[9,256], index: 1, kind: input, shape index: {}]   ;;  %s1076_s2 = inlined_call_operand.vmem [shape: bf16[8,36], index: 2, kind: input, shape index: {}]   ;;  %s1077_s3 = inlined_call_operand.vmem [shape: f32[8,1], index: 3, kind: input, shape index: {}]   ;;  %s1078_s4 = inlined_call_operand.vmem [shape: bf16[8,76], index: 4, kind: input, shape index: {}]   ;;  %s1079_s5 = inlined_call_operand.vmem [shape: f32[8,1], index: 5, kind: input, shape index: {}]   ;;  %s1080_s6 = inlined_call_operand.vmem [shape: f32[2,8,256], index: 6, kind: output, shape index: {}]  }
   0x1 LB: > { %s739_s22 = sadd.s32 4294967295, %s783_s21   ;;  %p743_p0 = scmp.ge.s32.totalorder %s783_s21, 1  ;;  %s783_s21 = sphi %s829_s21, %s16_s21  }
   0x2   : > { %p212_p1 = scmp.lt.s32.totalorder %s783_s21, 3 }
   0x4   : > { %p213_p2 = pnand %p743_p0, %p212_p1 }
   0x5   : > { %p242_p3 = scmp.lt.s32.totalorder (!%p213_p2), %s739_s22, 1  ;;  %s785_s27 = smov (!%p213_p2), 1   ;;  %v791_v2 = vmov (!%p213_p2), 0   ;;  %v461_v3 = vld [vmem:[%s1077_s3] sm:$0xff] (!%p213_p2)  ;;  %v270_v4 = vlaneseq (!%p213_p2)  ;;  %v895_v10 = vld [vmem:[%s1075_s1 + $0x8] sm:$0xff] (!%p213_p2)  ;;  %vm285_vm0 = vcmask (!%p213_p2), 130048  }
   0x6   : > { %216 = sbr.rel (%p213_p2) target bundleno = 760 (0x2f8), region = 44  ;;  %s786_s28 = smov (!%p213_p2), 16   ;;  %510 = vmatprep.mubr.bf16.mxu0 (!%p213_p2), %v791_v2  ;;  %775 = vset.pattern.permute.xlu0 (!%p213_p2), %v791_v2  ;;  %v890_v9 = vld [vmem:[%s1075_s1] sm:$0xff] (!%p213_p2)  ;;  %vm325_vm1 = vcmask (!%p213_p2), 7168   ;;  %vm265_vm2 = vcmask (!%p213_p2), 138240   ;;  %vm305_vm3 = vcmask (!%p213_p2), 121856  }
   0x7   : > { %s787_s29 = smov (!%p213_p2), 17   ;;  %s788_s30 = smov (!%p213_p2), 15   ;;  %671 = vmatprep.mubr.bf16.mxu1 (!%p213_p2), %v791_v2  ;;  %v884_v5 = vshrl.u32 (!%p213_p2), %v270_v4, 7  ;;  %vm445_vm4 = vcmask (!%p213_p2), 1043456   ;;  %vm344_vm5 = vcmask (!%p213_p2), 1039360   ;;  %vm384_vm6 = vcmask (!%p213_p2), 916480  }
   0x8   : > { %s789_s7 = smov (!%p213_p2), 127   ;;  %s790_s8 = smov (!%p213_p2), 112   ;;  %vm364_vm7 = vcmask (!%p213_p2), 924672   ;;  %vm404_vm8 = vcmask (!%p213_p2), 908288   ;;  %vm471_vm9 = vcmask (!%p213_p2), 1041408   ;;  %vm467_vm10 = vcmask (!%p213_p2), 293888  }
   0x9   : > { %s792_s9 = smov (!%p213_p2), 113   ;;  %s793_s10 = smov (!%p213_p2), 111   ;;  %v292_v8 = vsub.s32 (!%p213_p2), 1, %v884_v5  ;;  %v332_v11 = vsub.s32 (!%p213_p2), 3, %v884_v5  ;;  %v272_v16 = vsub.s32 (!%p213_p2), 0, %v884_v5  ;;  %v312_v21 = vsub.s32 (!%p213_p2), 2, %v884_v5 }
   0xa   : > { %v352_v36 = vsub.s32 (!%p213_p2), 5, %v884_v5  ;;  %v392_v41 = vsub.s32 (!%p213_p2), 7, %v884_v5  ;;  %v372_v2 = vsub.s32 (!%p213_p2), 6, %v884_v5  ;;  %vm632_vm11 = vcmask (!%p213_p2), 1045504  }
   0xb   : > { %v899_v13 = vrot.slane (!%p213_p2), %v890_v9, %v292_v8  ;;  %v902_v14 = vrot.slane (!%p213_p2), %v895_v10, %v292_v8  ;;  %v908_v19 = vrot.slane (!%p213_p2), %v890_v9, %v332_v11  ;;  %v911_v20 = vrot.slane (!%p213_p2), %v895_v10, %v332_v11 }
   0xc   : > { %v917_v25 = vrot.slane (!%p213_p2), %v890_v9, %v272_v16  ;;  %v920_v26 = vrot.slane (!%p213_p2), %v895_v10, %v272_v16  ;;  %v929_v34 = vrot.slane (!%p213_p2), %v890_v9, %v312_v21  ;;  %v932_v35 = vrot.slane (!%p213_p2), %v895_v10, %v312_v21 }
   0xd   : > { %s1082_s22 = smov (!%p242_p3, %s739_s22), 1  ;;  %v943_v50 = vrot.slane %v890_v9, %v352_v36  ;;  %v946_v51 = vrot.slane %v895_v10, %v352_v36  ;;  %v955_v62 = vrot.slane %v890_v9, %v392_v41  ;;  %v958_v63 = vrot.slane %v895_v10, %v392_v41 }
   0xe   : > { %s756_s23 = sshll.u32 %s1082_s22, 3  ;;  %v968_v16 = vrot.slane %v890_v9, %v372_v2  ;;  %v971_v5 = vrot.slane %v895_v10, %v372_v2  ;;  %v980_v9 = vld [vmem:[%s1075_s1 + $0x10] ss:$0 sm:$0xff]  ;;  %v985_v10 = vld [vmem:[%s1075_s1 + $0x18] ss:$0 sm:$0xff]  ;;  %vm628_vm12 = vcmask 621568  }
   0xf   : > { %s246_s26 = scalar_lea.vmem %s1074_s0, %s756_s23 }
  0x10   : > { %v843_v0 = vld [vmem:[%s246_s26] sm:$0xff] }
  0x11   : > { %323 = vrot.lane.b32.xlu1 %v843_v0, %s785_s27  ;;  %283 = vrot.lane.b32.xlu0 %v843_v0, %s786_s28  ;;  %v851_v1 = vcombine.high %v843_v0, %v843_v0 }
  0x15   : > { %263 = vrot.lane.b32.xlu1 %v843_v0, %s787_s29  ;;  %280 = vrot.lane.b32.xlu0 %v851_v1, %s786_s28 }
  0x19   : > { %320 = vrot.lane.b32.xlu1 %v851_v1, %s785_s27  ;;  %260 = vrot.lane.b32.xlu0 %v851_v1, %s787_s29 }
  0x1d   : > { %303 = vrot.lane.b32.xlu1 %v843_v0, %s788_s30  ;;  %300 = vrot.lane.b32.xlu0 %v851_v1, %s788_s30 }
  0x21   : > { %342 = vrot.lane.b32.xlu1 %v851_v1, %s789_s7  ;;  %340 = vrot.lane.b32.xlu0 %v843_v0, %s789_s7 }
  0x25   : > { %382 = vrot.lane.b32.xlu1 %v851_v1, %s790_s8  ;;  %380 = vrot.lane.b32.xlu0 %v843_v0, %s790_s8 }
  0x29   : > { %362 = vrot.lane.b32.xlu1 %v851_v1, %s792_s9  ;;  %360 = vrot.lane.b32.xlu0 %v843_v0, %s792_s9 }
  0x2d   : > { %402 = vrot.lane.b32.xlu1 %v851_v1, %s793_s10  ;;  %400 = vrot.lane.b32.xlu0 %v843_v0, %s793_s10 }
  0x31   : > { %464 = vperm.xlu0 %775, %v461_v3  }
  0x83   : > { %v324_v6 = vpop.permute.xlu1 %323  ;;  %v284_v7 = vpop.permute.xlu0 %283 }
  0x87   : > { %v264_v12 = vpop.permute.xlu1 %263  ;;  %v281_v15 = vpop.permute.xlu0 %280 }
  0x88   : > { %v286_v17 = vsel %vm285_vm0, %v284_v7, %v281_v15  ;;  %v289_v18 = vsel %vm285_vm0, %v281_v15, %v284_v7 }
  0x89   : > { %v298_v22 = vmul.f32 %v899_v13, %v289_v18  ;;  %v299_v23 = vmul.f32 %v902_v14, %v286_v17 }
  0x8b   : > { %v321_v24 = vpop.permute.xlu1 %320  ;;  %v261_v27 = vpop.permute.xlu0 %260  ;;  %v422_v42 = vrot.slane %v298_v22, 4  ;;  %v423_v43 = vrot.slane %v299_v23, 4 }
  0x8c   : > { %v326_v28 = vsel %vm325_vm1, %v324_v6, %v321_v24  ;;  %v329_v29 = vsel %vm325_vm1, %v321_v24, %v324_v6  ;;  %v266_v30 = vsel %vm265_vm2, %v264_v12, %v261_v27  ;;  %v269_v31 = vsel %vm265_vm2, %v261_v27, %v264_v12 }
  0x8d   : > { %v338_v32 = vmul.f32 %v908_v19, %v329_v29  ;;  %v339_v33 = vmul.f32 %v911_v20, %v326_v28  ;;  %v278_v37 = vmul.f32 %v917_v25, %v269_v31  ;;  %v279_v38 = vmul.f32 %v920_v26, %v266_v30 }
  0x8f   : > { %v304_v39 = vpop.permute.xlu1 %303  ;;  %v301_v40 = vpop.permute.xlu0 %300  ;;  %v428_v46 = vrot.slane %v338_v32, 4  ;;  %v429_v47 = vrot.slane %v339_v33, 4  ;;  %v447_v54 = vsel %vm445_vm4, %v279_v38, %v423_v43  ;;  %v446_v56 = vsel %vm445_vm4, %v278_v37, %v422_v42 }
  0x90   : > { %v306_v44 = vsel %vm305_vm3, %v304_v39, %v301_v40  ;;  %v309_v45 = vsel %vm305_vm3, %v301_v40, %v304_v39 }
  0x91   : > { %v318_v48 = vmul.f32 %v929_v34, %v309_v45  ;;  %v319_v49 = vmul.f32 %v932_v35, %v306_v44 }
  0x93   : > { %v343_v52 = vpop.permute.xlu1 %342  ;;  %v341_v53 = vpop.permute.xlu0 %340  ;;  %v449_v55 = vsel %vm445_vm4, %v319_v49, %v429_v47  ;;  %v448_v57 = vsel %vm445_vm4, %v318_v48, %v428_v46  ;;  %v454_v48 = vld [vmem:[%s1076_s2] sm:$0xf] }
  0x94   : > { %v345_v58 = vsel %vm344_vm5, %v341_v53, %v343_v52  ;;  %v349_v59 = vsel %vm344_vm5, %v343_v52, %v341_v53  ;;  %v456_v60 = vpack.c.bf16 %v449_v55, %v447_v54  ;;  %v455_v61 = vpack.c.bf16 %v448_v57, %v446_v56 }
  0x95   : > { %v358_v3 = vmul.f32 %v943_v50, %v345_v58  ;;  %v359_v4 = vmul.f32 %v946_v51, %v349_v59 }
  0x96   : > { %478 = vmatprep.subr.bf16.mxu0 %v456_v60  ;;  %v622_v60 = vld [vmem:[%s1079_s5] sm:$0xff] }
  0x97   : > { %v383_v6 = vpop.permute.xlu1 %382  ;;  %479 = vmatpush1.bf16.msra.mxu0 %v455_v61  ;;  %v381_v7 = vpop.permute.xlu0 %380  ;;  %v435_v17 = vrot.slane %v358_v3, 4  ;;  %v436_v18 = vrot.slane %v359_v4, 4 }
  0x98   : > { %v385_v8 = vsel %vm384_vm6, %v381_v7, %v383_v6  ;;  %v389_v11 = vsel %vm384_vm6, %v383_v6, %v381_v7 }
  0x99   : > { %v398_v12 = vmul.f32 %v955_v62, %v385_v8  ;;  %v399_v15 = vmul.f32 %v958_v63, %v389_v11  ;;  %v451_v33 = vsel %vm445_vm4, %v851_v1, %v436_v18  ;;  %v450_v37 = vsel %vm445_vm4, %v843_v0, %v435_v17 }
  0x9b   : > { %v363_v21 = vpop.permute.xlu1 %362  ;;  %v361_v22 = vpop.permute.xlu0 %360  ;;  %v441_v27 = vrot.slane %v398_v12, 4  ;;  %v442_v28 = vrot.slane %v399_v15, 4 }
  0x9c   : > { %v365_v23 = vsel %vm364_vm7, %v361_v22, %v363_v21  ;;  %v369_v24 = vsel %vm364_vm7, %v363_v21, %v361_v22 }
  0x9d   : > { %v378_v29 = vmul.f32 %v968_v16, %v365_v23  ;;  %v379_v30 = vmul.f32 %v971_v5, %v369_v24 }
  0x9f   : > { %v403_v31 = vpop.permute.xlu1 %402  ;;  %v401_v32 = vpop.permute.xlu0 %400  ;;  %v453_v36 = vsel %vm445_vm4, %v379_v30, %v442_v28  ;;  %v452_v38 = vsel %vm445_vm4, %v378_v29, %v441_v27 }
  0xa0   : > { %v405_v39 = vsel %vm404_vm8, %v401_v32, %v403_v31  ;;  %v409_v40 = vsel %vm404_vm8, %v403_v31, %v401_v32  ;;  %v458_v41 = vpack.c.bf16 %v453_v36, %v451_v33  ;;  %v457_v42 = vpack.c.bf16 %v452_v38, %v450_v37 }
  0xa1   : > { %v418_v43 = vmul.f32 %v980_v9, %v405_v39  ;;  %v419_v44 = vmul.f32 %v985_v10, %v409_v40 }
  0xa2   : > { %480 = vmatprep.subr.bf16.mxu0 %v458_v41 }
  0xa3   : > { %v459_v45 = vpack.c.bf16 %v418_v43, %v418_v43  ;;  %v460_v46 = vpack.c.bf16 %v419_v44, %v419_v44  ;;  %481 = vmatpush1.bf16.msra.mxu0 %v457_v42 }
  0xa5   : > { %750 = vmatprep.subr.msk.bf16.mxu0 %vm471_vm9, %v460_v46  ;;  %v473_v47 = vsel %vm471_vm9, %v459_v45, 0 }
  0xa7   : > { %483 = vmatpush1.bf16.msra.mxu0 %v473_v47 }
  0xaa   : > { %751 = vmatmul.mubr.msk.bf16.vlgmr.msra.gmra.mrb[0].mxu0 %vm467_vm10, %v454_v48 }
  0xb0   : > { %v465_v49 = vpop.permute.xlu0 %464 }
 0x17d   : > { %v512_v52 = vpop.f32.mrb[0].mxu0 }
 0x17e   : > { %v513_v53 = vadd.f32 %v512_v52, %v465_v49  ;;  %v514_v54 = vpop.f32.mrb[1].mxu0 }
 0x17f   : > { %v516_v55 = vpop.f32.mrb[2].mxu0  ;;  %v515_v57 = vadd.f32 %v514_v54, %v465_v49 }
 0x180   : > { %v1000_v56 = vmax.f32 %v513_v53, 0.0  ;;  %v517_v58 = vpop.f32.mrb[3].mxu0 }
 0x181   : > { %v520_v59 = vmax.f32 %v515_v57, 0.0 }
 0x182   : > { %567 = vrot.lane.b32.xlu0 %v1000_v56, %s789_s7  ;;  %526 = vrot.lane.b32.xlu1 %v1000_v56, %s787_s29 }
 0x186   : > { %534 = vrot.lane.b32.xlu0 %v520_v59, %s786_s28  ;;  %537 = vrot.lane.b32.xlu1 %v1000_v56, %s786_s28 }
 0x18a   : > { %545 = vrot.lane.b32.xlu0 %v520_v59, %s788_s30  ;;  %548 = vrot.lane.b32.xlu1 %v1000_v56, %s788_s30 }
 0x18e   : > { %556 = vrot.lane.b32.xlu0 %v520_v59, %s785_s27  ;;  %559 = vrot.lane.b32.xlu1 %v1000_v56, %s785_s27 }
 0x192   : > { %578 = vrot.lane.b32.xlu0 %v1000_v56, %s792_s9  ;;  %522 = vrot.lane.b32.xlu1 %v520_v59, %s787_s29  ;;  %s757_s29 = sshll.u32 %s1082_s22, 4 }
 0x196   : > { %589 = vrot.lane.b32.xlu0 %v1000_v56, %s790_s8  ;;  %569 = vrot.lane.b32.xlu1 %v520_v59, %s789_s7 }
 0x19a   : > { %600 = vrot.lane.b32.xlu0 %v1000_v56, %s793_s10  ;;  %580 = vrot.lane.b32.xlu1 %v520_v59, %s792_s9 }
 0x19e   : > { %625 = vperm.xlu0 %775, %v622_v60   ;;  %591 = vrot.lane.b32.xlu1 %v520_v59, %s790_s8  ;;  %v611_v60 = vld [vmem:[%s1078_s4] sm:$0xf]  ;;  %s251_s8 = scalar_lea.vmem %s1080_s6, %s757_s29 }
 0x1a2   : > { %602 = vrot.lane.b32.xlu1 %v520_v59, %s793_s10 }
 0x1f4   : > { %v568_v61 = vpop.permute.xlu0 %567  ;;  %v527_v2 = vpop.permute.xlu1 %526 }
 0x1f8   : > { %v535_v3 = vpop.permute.xlu0 %534  ;;  %v538_v4 = vpop.permute.xlu1 %537 }
 0x1f9   : > { %v542_v12 = vsel %vm285_vm0, %v535_v3, %v538_v4  ;;  %v539_v15 = vsel %vm285_vm0, %v538_v4, %v535_v3 }
 0x1fa   : > { %v543_v18 = vmul.f32 %v542_v12, %v899_v13  ;;  %v544_v27 = vmul.f32 %v539_v15, %v902_v14 }
 0x1fc   : > { %v546_v6 = vpop.permute.xlu0 %545  ;;  %v549_v7 = vpop.permute.xlu1 %548 }
 0x1fd   : > { %v550_v22 = vsel %vm305_vm3, %v549_v7, %v546_v6  ;;  %v553_v32 = vsel %vm305_vm3, %v546_v6, %v549_v7 }
 0x1fe   : > { %v555_v13 = vmul.f32 %v550_v22, %v932_v35 }
 0x200   : > { %v557_v8 = vpop.permute.xlu0 %556  ;;  %v560_v11 = vpop.permute.xlu1 %559 }
 0x201   : > { %v561_v17 = vsel %vm325_vm1, %v560_v11, %v557_v8  ;;  %v564_v28 = vsel %vm325_vm1, %v557_v8, %v560_v11 }
 0x202   : > { %v566_v29 = vmul.f32 %v561_v17, %v911_v20  ;;  %v565_v39 = vmul.f32 %v564_v28, %v908_v19 }
 0x204   : > { %v523_v21 = vpop.permute.xlu1 %522  ;;  %v579_v33 = vpop.permute.xlu0 %578 }
 0x205   : > { %v528_v23 = vsel %vm265_vm2, %v527_v2, %v523_v21  ;;  %v531_v24 = vsel %vm265_vm2, %v523_v21, %v527_v2 }
 0x206   : > { %v532_v30 = vmul.f32 %v531_v24, %v917_v25  ;;  %v533_v31 = vmul.f32 %v528_v23, %v920_v26  ;;  %v615_v25 = vpack.c.bf16 %v566_v29, %v555_v13  ;;  %v554_v26 = vmul.f32 %v553_v32, %v929_v34 }
 0x208   : > { %v570_v36 = vpop.permute.xlu1 %569  ;;  %v613_v37 = vpack.c.bf16 %v544_v27, %v533_v31  ;;  %v612_v38 = vpack.c.bf16 %v543_v18, %v532_v30  ;;  %v614_v42 = vpack.c.bf16 %v565_v39, %v554_v26  ;;  %v590_v43 = vpop.permute.xlu0 %589 }
 0x209   : > { %v575_v14 = vsel %vm344_vm5, %v570_v36, %v568_v61  ;;  %v571_v40 = vsel %vm344_vm5, %v568_v61, %v570_v36 }
 0x20a   : > { %v577_v20 = vmul.f32 %v575_v14, %v946_v51  ;;  %639 = vmatprep.subr.bf16.mxu1 %v613_v37  ;;  %v576_v35 = vmul.f32 %v571_v40, %v943_v50 }
 0x20b   : > { %640 = vmatpush1.bf16.msra.mxu1 %v612_v38 }
 0x20c   : > { %641 = vmatprep.subr.bf16.mxu1 %v615_v25  ;;  %v581_v41 = vpop.permute.xlu1 %580  ;;  %v617_v44 = vpack.c.bf16 %v577_v20, %v520_v59  ;;  %v616_v34 = vpack.c.bf16 %v576_v35, %v1000_v56  ;;  %v601_v53 = vpop.permute.xlu0 %600 }
 0x20d   : > { %v582_v19 = vsel %vm364_vm7, %v579_v33, %v581_v41  ;;  %v586_v45 = vsel %vm364_vm7, %v581_v41, %v579_v33 }
 0x20e   : > { %v587_v48 = vmul.f32 %v582_v19, %v968_v16  ;;  %v588_v50 = vmul.f32 %v586_v45, %v971_v5 }
 0x20f   : > { %642 = vmatpush1.bf16.msra.mxu1 %v614_v42 }
 0x210   : > { %643 = vmatprep.subr.bf16.mxu1 %v617_v44  ;;  %v592_v46 = vpop.permute.xlu1 %591 }
 0x211   : > { %v593_v51 = vsel %vm384_vm6, %v590_v43, %v592_v46  ;;  %v597_v47 = vsel %vm384_vm6, %v592_v46, %v590_v43 }
 0x212   : > { %v598_v49 = vmul.f32 %v593_v51, %v955_v62  ;;  %v599_v52 = vmul.f32 %v597_v47, %v958_v63 }
 0x213   : > { %644 = vmatpush1.bf16.msra.mxu1 %v616_v34 }
 0x214   : > { %v603_v54 = vpop.permute.xlu1 %602  ;;  %v619_v55 = vpack.c.bf16 %v599_v52, %v588_v50  ;;  %v618_v57 = vpack.c.bf16 %v598_v49, %v587_v48 }
 0x215   : > { %v604_v58 = vsel %vm404_vm8, %v601_v53, %v603_v54  ;;  %v608_v59 = vsel %vm404_vm8, %v603_v54, %v601_v53 }
 0x216   : > { %v609_v56 = vmul.f32 %v980_v9, %v604_v58  ;;  %v610_v16 = vmul.f32 %v985_v10, %v608_v59  ;;  %645 = vmatprep.subr.bf16.mxu1 %v619_v55 }
 0x217   : > { %646 = vmatpush1.bf16.msra.mxu1 %v618_v57 }
 0x218   : > { %v621_v62 = vpack.c.bf16 %v851_v1, %v610_v16  ;;  %v620_v63 = vpack.c.bf16 %v843_v0, %v609_v56 }
 0x21a   : > { %752 = vmatprep.subr.msk.bf16.mxu1 %vm632_vm11, %v621_v62  ;;  %v634_v5 = vsel %vm632_vm11, %v620_v63, 0 }
 0x21b   : > { %648 = vmatpush1.bf16.msra.mxu1 %v634_v5 }
 0x21d   : > { %v626_v9 = vpop.permute.xlu0 %625 }
 0x21e   : > { %753 = vmatmul.mubr.msk.bf16.vlgmr.msra.gmra.mrb[0].mxu1 %vm628_vm12, %v611_v60 }
 0x2f1   : > { %v673_v61 = vpop.f32.mrb[0].mxu1 }
 0x2f2   : > { %v674_v10 = vadd.f32 %v673_v61, %v626_v9  ;;  %v675_v2 = vpop.f32.mrb[1].mxu1 }
 0x2f3   : > { %v676_v1 = vadd.f32 %v675_v2, %v626_v9  ;;  %v677_v0 = vpop.f32.mrb[2].mxu1 }
 0x2f4   : > { %v680_v3 = vmax.f32 %v674_v10, 0.0  ;;  %v678_v4 = vpop.f32.mrb[3].mxu1 }
 0x2f5   : > { %v681_v6 = vmax.f32 %v676_v1, 0.0 }
 0x2f6   : > { %682 = vst [vmem:[%s251_s8] sm:$0xff] %v680_v3 }
 0x2f7   : > { %683 = vst [vmem:[%s251_s8 + $0x8] sm:$0xff] %v681_v6 }
 0x2f8 PF: > { %s16_s21 = sadd.s32 1, %s783_s21  }
 0x2f9   : > { %p13_p4 = scmp.ge.s32.totalorder %s16_s21, 4  }
 0x2fb   :  { %15 = sbr.rel (!%p13_p4) target bundleno = 1 (0x1), region = 74 }

</bundles_post_ra>
